<compile_context>
chip_gen: v6e
topology: v6e:2x2x1
jax: 0.10.0
libtpu: 0.0.40
codegen_flags: <defaults>
</compile_context>

<pallas_src>
import jax
import jax.numpy as jnp
from jax.experimental import pallas as pl
from jax.experimental.pallas import tpu as pltpu


def _round_up(x, m):
    return ((x + m - 1) // m) * m


def _make_kernel(total_rows, ragged, use_mxu_mean):
    """Build the kernel. total_rows / ragged / use_mxu_mean are static."""

    def _compute(dyn_ref, gt_ref, ones_ref, acc_ref):
        s = pl.program_id(0)
        i = pl.program_id(1)

        # Accumulator (output block resident across the arbitrary axis): init
        # once per split.
        @pl.when(i == 0)
        def _():
            acc_ref[...] = jnp.zeros_like(acc_ref)

        gt = gt_ref[...].astype(jnp.float32)
        dyn = dyn_ref[...].astype(jnp.float32)
        tr, T = gt.shape

        if use_mxu_mean:
            # Broadcast per-row mean on the MXU: (tr,T) @ (T,T)*(1/T) gives the
            # row mean in every lane, so no XLU reduce/broadcast in the hot
            # loop.  HIGHEST precision keeps f32 accuracy for the mean.
            mean_b = jnp.dot(
                gt,
                ones_ref[...],
                preferred_element_type=jnp.float32,
                precision=jax.lax.Precision.HIGHEST,
            )
        else:
            # Fallback for very large T (ones matrix would not fit VMEM).
            mean_b = jnp.mean(gt, axis=-1, keepdims=True)

        diff = dyn - gt + mean_b
        sq = diff * diff

        def _fold_add(x):
            # Layout-preserving sublane fold (tr,T) -> (8,T): pure VPU adds,
            # 128-lane axis stays dense.  The one expensive full reduce is done
            # once in the wrapper, outside the grid loop.
            acc_ref[...] += x.reshape(-1, 8, T).sum(axis=0)

        if ragged:
            # Only the boundary tile pays for a mask (one VPU select); all
            # other tiles take the unmasked branch.
            row0 = (s * pl.num_programs(1) + i) * tr
            is_full = row0 + tr <= total_rows

            @pl.when(is_full)
            def _():
                _fold_add(sq)

            @pl.when(jnp.logical_not(is_full))
            def _():
                # Rows past the true row count hold unspecified data from the
                # partially out-of-bounds boundary block; the select picks 0
                # there, so garbage / NaNs cannot propagate into the sum.
                rows = jax.lax.broadcasted_iota(jnp.int32, (tr, 1), 0) + row0
                _fold_add(jnp.where(rows < total_rows, sq, 0.0))
        else:
            _fold_add(sq)

    if use_mxu_mean:
        def kernel(dyn_ref, gt_ref, ones_ref, acc_ref):
            _compute(dyn_ref, gt_ref, ones_ref, acc_ref)
    else:
        def kernel(dyn_ref, gt_ref, acc_ref):
            _compute(dyn_ref, gt_ref, None, acc_ref)
    return kernel


def audio_loss(dynamics, gt_poses, *, n_split=1, tile_vmem_budget=None):
    """MSE(dynamics, gt_poses - mean(gt_poses, axis=-1, keepdims=True)).

    n_split: number of independent partial-sum streams along the leading
    ("parallel") grid axis.  Keep 1 on single-TensorCore chips (v5e/v6e);
    use 2 on 2-TC chips (v7x).
    """
    assert dynamics.shape == gt_poses.shape
    *lead, T = dynamics.shape
    R = 1
    for d in lead:
        R *= d
    R = max(R, 1)
    dyn2 = dynamics.reshape(R, T)
    gt2 = gt_poses.reshape(R, T)
    itemsize = jnp.dtype(dyn2.dtype).itemsize
    total = R * T

    # Dtype-aware sublane granularity: 8 rows for 32-bit, 16 for bf16,
    # 32 for int8/fp8 (native packed tiles).
    sub = 8 * max(1, 4 // itemsize)

    # Derive VMEM sizing from the actual chip (64 MiB/TC on v7x, 128 MiB on
    # v5e/v6e) instead of hard-coding numbers.
    try:
        vmem_cap = pltpu.get_tpu_info().vmem_capacity_bytes
    except Exception:  # conservative (v7x-sized) fallback
        vmem_cap = 64 << 20
    if tile_vmem_budget is None:
        tile_vmem_budget = vmem_cap // 6
    vmem_limit = int(max(32 << 20, min(vmem_cap - (8 << 20), 96 << 20)))

    # MXU-broadcast mean needs a (T, T)/T constant resident in VMEM; fall back
    # to the XLU mean when that constant would be too large.
    use_mxu_mean = (T * T * 4) <= (4 << 20)
    ones_bytes = 2 * T * T * 4 if use_mxu_mean else 0

    # Row tile: biggest tile within the budget.
    #   footprint ~ 2 inputs * 2 pipeline buffers * tr*T*itemsize
    #             + ~4 f32 (tr, T) temporaries inside the body.
    per_row_bytes = T * (4 * itemsize + 16)
    tr_cap = max(sub, ((tile_vmem_budget - ones_bytes) // per_row_bytes) // sub * sub)
    rows_per_split = pl.cdiv(R, n_split)
    tr = min(tr_cap, 1024, _round_up(rows_per_split, sub))
    tr = max(tr, sub)

    total_tiles = pl.cdiv(R, tr)
    tiles_per_split = pl.cdiv(total_tiles, n_split)
    ragged = (n_split * tiles_per_split * tr) != R
    last_tile = total_tiles - 1

    # Clamp so any surplus grid step (when n_split does not divide the tile
    # count) re-reads the last real tile; its rows are fully masked in-kernel,
    # contributing exactly zero.
    in_map = lambda s, i: (jnp.minimum(s * tiles_per_split + i, last_tile), 0)

    in_specs = [
        pl.BlockSpec((tr, T), in_map),
        pl.BlockSpec((tr, T), in_map),
    ]
    args = [dyn2, gt2]
    if use_mxu_mean:
        ones = jnp.full((T, T), 1.0 / T, dtype=jnp.float32)
        in_specs.append(pl.BlockSpec((T, T), lambda s, i: (0, 0)))  # resident
        args.append(ones)

    kernel = _make_kernel(R, ragged, use_mxu_mean)

    partials = pl.pallas_call(
        kernel,
        out_shape=jax.ShapeDtypeStruct((n_split * 8, T), jnp.float32),
        grid_spec=pltpu.PrefetchScalarGridSpec(
            num_scalar_prefetch=0,
            grid=(n_split, tiles_per_split),
            in_specs=in_specs,
            out_specs=pl.BlockSpec((8, T), lambda s, i: (s, 0)),
        ),
        compiler_params=pltpu.CompilerParams(
            dimension_semantics=("parallel", "arbitrary"),
            vmem_limit_bytes=vmem_limit,
        ),
        cost_estimate=pl.CostEstimate(
            flops=int((2 * R * T * T if use_mxu_mean else 0) + 6 * R * T),
            transcendentals=0,
            bytes_accessed=int(2 * R * T * itemsize + ones_bytes // 2
                               + n_split * 8 * T * 4),
        ),
    )(*args)

    # Single tiny reduce + normalization by the TRUE element count.
    return jnp.sum(partials) / total


def _ref_loss(dynamics, gt_poses):
    gt_centered = gt_poses - jnp.mean(gt_poses, axis=-1, keepdims=True)
    return jnp.mean((dynamics - gt_centered) ** 2)


if __name__ == "__main__":
    key = jax.random.PRNGKey(0)
    k1, k2, k3, k4 = jax.random.split(key, 4)

    # dynamics / gt_poses: [batch, pose_dim, seq]
    B, J, T = 2, 8, 128
    dynamics = jax.random.normal(k1, (B, J, T), dtype=jnp.float32)
    gt_poses = jax.random.normal(k2, (B, J, T), dtype=jnp.float32)

    loss = jax.block_until_ready(audio_loss(dynamics, gt_poses))
    ref = _ref_loss(dynamics, gt_poses)
    assert jnp.allclose(loss, ref, rtol=2e-5, atol=2e-6), (loss, ref)

    # non-divisible row count + 2-way split exercises the in-kernel mask path
    dyn_b = jax.random.normal(k3, (3, 5, 128), dtype=jnp.float32)
    gt_b = jax.random.normal(k4, (3, 5, 128), dtype=jnp.float32)
    loss_b = jax.block_until_ready(audio_loss(dyn_b, gt_b, n_split=2))
    ref_b = _ref_loss(dyn_b, gt_b)
    assert jnp.allclose(loss_b, ref_b, rtol=2e-5, atol=2e-6), (loss_b, ref_b)

    # bf16 inputs exercise the dtype-aware (16,128) tiling fast path
    dyn_h = dyn_b.astype(jnp.bfloat16)
    gt_h = gt_b.astype(jnp.bfloat16)
    loss_h = jax.block_until_ready(audio_loss(dyn_h, gt_h))
    ref_h = _ref_loss(dyn_h.astype(jnp.float32), gt_h.astype(jnp.float32))
    assert jnp.allclose(loss_h, ref_h, rtol=1e-3, atol=1e-4), (loss_h, ref_h)

    print("KERNEL_OK")
</pallas_src>

<mosaic_0001>
module attributes {stable_mosaic.version = 11 : i64} {
  func.func @kernel(%arg0: i32, %arg1: i32, %arg2: memref<16x128xf32, #tpu.memory_space<vmem>>, %arg3: memref<16x128xf32, #tpu.memory_space<vmem>>, %arg4: memref<128x128xf32, #tpu.memory_space<vmem>>, %arg5: memref<8x128xf32, #tpu.memory_space<vmem>>) attributes {dimension_semantics = [#tpu.dimension_semantics<parallel>, #tpu.dimension_semantics<arbitrary>], iteration_bounds = array<i64: 1, 1>, scalar_prefetch = 0 : i64, scratch_operands = 0 : i64, tpu.core_type = #tpu.core_type<tc>, window_params = [{transform_indices = @transform_0, window_bounds = array<i64: 16, 128>}, {transform_indices = @transform_1, window_bounds = array<i64: 16, 128>}, {pipeline_mode = #tpu.pipeline_mode<synchronous>, transform_indices = @transform_2, window_bounds = array<i64: 128, 128>}, {transform_indices = @transform_3, window_bounds = array<i64: 8, 128>}]} {
    %c0_i32 = arith.constant 0 : i32
    %0 = arith.cmpi eq, %arg1, %c0_i32 : i32
    %1 = arith.extui %0 : i1 to i32
    %c0_i32_0 = arith.constant 0 : i32
    %2 = arith.cmpi ne, %1, %c0_i32_0 : i32
    scf.if %2 {
      %cst_11 = arith.constant 0.000000e+00 : f32
      %15 = vector.broadcast %cst_11 : f32 to vector<8x128xf32>
      %c0_12 = arith.constant 0 : index
      %c0_13 = arith.constant 0 : index
      %16 = vector.load %arg5[%c0_12, %c0_13] : memref<8x128xf32, #tpu.memory_space<vmem>>, vector<8x128xf32>
      tpu.vector_store %arg5[%c0_12, %c0_13], %15 {strides = array<i32>} : memref<8x128xf32, #tpu.memory_space<vmem>>, vector<8x128xf32>,
    } else {
    }
    %c0 = arith.constant 0 : index
    %c0_1 = arith.constant 0 : index
    %3 = vector.load %arg3[%c0, %c0_1] : memref<16x128xf32, #tpu.memory_space<vmem>>, vector<16x128xf32>
    %c0_2 = arith.constant 0 : index
    %c0_3 = arith.constant 0 : index
    %4 = vector.load %arg2[%c0_2, %c0_3] : memref<16x128xf32, #tpu.memory_space<vmem>>, vector<16x128xf32>
    %c0_4 = arith.constant 0 : index
    %c0_5 = arith.constant 0 : index
    %5 = vector.load %arg4[%c0_4, %c0_5] : memref<128x128xf32, #tpu.memory_space<vmem>>, vector<128x128xf32>
    %cst = arith.constant dense<0.000000e+00> : vector<16x128xf32>
    %6 = tpu.matmul %3, %5, %cst {dimension_numbers = #tpu.dot_dimension_numbers<[1], [0], [0], [1], [0, 0, 1, 1], [], []>, precision = #tpu.contract_precision<fp32>} : vector<16x128xf32>, vector<128x128xf32>, vector<16x128xf32> -> vector<16x128xf32>
    %7 = arith.subf %4, %3 : vector<16x128xf32>
    %8 = arith.addf %7, %6 : vector<16x128xf32>
    %9 = arith.mulf %8, %8 : vector<16x128xf32>
    %c0_6 = arith.constant 0 : index
    %c0_7 = arith.constant 0 : index
    %10 = vector.load %arg5[%c0_6, %c0_7] : memref<8x128xf32, #tpu.memory_space<vmem>>, vector<8x128xf32>
    %11 = vector.shape_cast %9 : vector<16x128xf32> to vector<2x8x128xf32>
    %cst_8 = arith.constant dense<0.000000e+00> : vector<8x128xf32>
    %12 = vector.multi_reduction <add>, %11, %cst_8 [0] : vector<2x8x128xf32> to vector<8x128xf32>
    %13 = arith.addf %10, %12 : vector<8x128xf32>
    %c0_9 = arith.constant 0 : index
    %c0_10 = arith.constant 0 : index
    %14 = vector.load %arg5[%c0_9, %c0_10] : memref<8x128xf32, #tpu.memory_space<vmem>>, vector<8x128xf32>
    tpu.vector_store %arg5[%c0_9, %c0_10], %13 {strides = array<i32>} : memref<8x128xf32, #tpu.memory_space<vmem>>, vector<8x128xf32>,
    return
  }
  func.func @transform_0(%arg0: i32, %arg1: i32) -> (i32, i32) {
    %c1_i32 = arith.constant 1 : i32
    %0 = arith.muli %arg0, %c1_i32 : i32
    %1 = arith.addi %0, %arg1 : i32
    %c0_i32 = arith.constant 0 : i32
    %2 = arith.minsi %1, %c0_i32 : i32
    %c0_i32_0 = arith.constant 0 : i32
    %c0_i32_1 = arith.constant 0 : i32
    return %2, %c0_i32_0 : i32, i32
  }
  func.func @transform_1(%arg0: i32, %arg1: i32) -> (i32, i32) {
    %c1_i32 = arith.constant 1 : i32
    %0 = arith.muli %arg0, %c1_i32 : i32
    %1 = arith.addi %0, %arg1 : i32
    %c0_i32 = arith.constant 0 : i32
    %2 = arith.minsi %1, %c0_i32 : i32
    %c0_i32_0 = arith.constant 0 : i32
    %c0_i32_1 = arith.constant 0 : i32
    return %2, %c0_i32_0 : i32, i32
  }
  func.func @transform_2(%arg0: i32, %arg1: i32) -> (i32, i32) {
    %c0_i32 = arith.constant 0 : i32
    %c0_i32_0 = arith.constant 0 : i32
    %c0_i32_1 = arith.constant 0 : i32
    return %c0_i32, %c0_i32_0 : i32, i32
  }
  func.func @transform_3(%arg0: i32, %arg1: i32) -> (i32, i32) {
    %c0_i32 = arith.constant 0 : i32
    %c0_i32_0 = arith.constant 0 : i32
    return %arg0, %c0_i32 : i32, i32
  }
}

</mosaic_0001>

<bundles_post_ra>
// kernel: tpu_custom_call.1
= control target key start
LH: loop header
LB: loop body
LE: loop exit
PB: predicated region body
PF: predicated region fallthrough
CT: control target
= control target key end

     0   :  { %8 = vsyncpa [#allocation3], 0  ;;  %s1624_s0 = inlined_call_operand.hbm [shape: f32[16,128], index: 0, kind: input, shape index: {}]   ;;  %s1625_s1 = inlined_call_operand.hbm [shape: f32[16,128], index: 1, kind: input, shape index: {}]   ;;  %s1626_s2 = inlined_call_operand.hbm [shape: f32[128,128], index: 2, kind: input, shape index: {}]   ;;  %s1627_s3 = inlined_call_operand.hbm [shape: f32[8,128], index: 3, kind: output, shape index: {}]  }
   0x1   :  { %9 = vsyncpa [#allocation6], 0 }
   0x2   :  { %10 = vsyncpa [#allocation4], 0  ;;  %s1226_s12 = smov [#allocation5]   ;;  %s1227_s14 = smov [#allocation2]  }
   0x3   :  { %s40_s13 = sshll.u32 %s1226_s12, 4  ;;  %s22_s15 = sshll.u32 %s1227_s14, 4  ;;  %s41_s13 = int_to_ptr.vmem [resolvable:$true] %s40_s13  ;;  %s23_s15 = int_to_ptr.vmem [resolvable:$true] %s22_s15 }
   0x4   :  { %s1148_s16 = scalar_lea.vmem %s41_s13, 256  ;;  %p1153_p1 = scmp.lt.s32.totalorder %s41_s13, %s41_s13 }
   0x5   :  { %p1149_p0 = scmp.ne.s32.totalorder %s41_s13, %s1148_s16  ;;  %p1154_p2 = scmp.lt.s32.totalorder %s1148_s16, %s1148_s16 }
   0x7   :  { %p1155_p3 = por %p1154_p2, %p1153_p1 }
   0x9   :  { %p1156_p4 = pnand %p1155_p3, %p1149_p0 }
   0xb   :  { %1159 = shalt.err (!%p1156_p4)
}
   0xc   :  { %s1228_s17 = smov 128   ;;  %s1229_s18 = smov 8  }
   0xd   :  { %46 = dma.hbm_to_vmem [thread:$0]  %s1625_s1, 256, %s41_s13, [#allocation6], %s1228_s17, %s1228_s17, %s1229_s18  }
   0xe   :  { %s1168_s21 = scalar_lea.vmem %s23_s15, 256  ;;  %p1173_p6 = scmp.lt.s32.totalorder %s23_s15, %s23_s15 }
   0xf   :  { %p1169_p5 = scmp.ne.s32.totalorder %s23_s15, %s1168_s21  ;;  %p1174_p7 = scmp.lt.s32.totalorder %s1168_s21, %s1168_s21 }
  0x11   :  { %p1175_p8 = por %p1174_p7, %p1173_p6 }
  0x13   :  { %p1176_p9 = pnand %p1175_p8, %p1169_p5 }
  0x15   :  { %1179 = shalt.err (!%p1176_p9)
}
  0x16   :  { %28 = dma.hbm_to_vmem [thread:$0]  %s1624_s0, 256, %s23_s15, [#allocation3], %s1228_s17, %s1228_s17, %s1229_s18  }
  0x17   :  { %s1230_s24 = smov [#allocation7]  }
  0x18   :  { %s52_s25 = sshll.u32 %s1230_s24, 4  ;;  %s53_s25 = int_to_ptr.vmem [resolvable:$true] %s52_s25 }
  0x19   :  { %s1188_s26 = scalar_lea.vmem %s53_s25, 2048  ;;  %p1193_p11 = scmp.lt.s32.totalorder %s53_s25, %s53_s25 }
  0x1a   :  { %p1189_p10 = scmp.ne.s32.totalorder %s53_s25, %s1188_s26  ;;  %p1194_p12 = scmp.lt.s32.totalorder %s1188_s26, %s1188_s26 }
  0x1c   :  { %p1195_p13 = por %p1194_p12, %p1193_p11 }
  0x1e   :  { %p1196_p0 = pnand %p1195_p13, %p1189_p10 }
  0x20   :  { %1199 = shalt.err (!%p1196_p0)
}
  0x21   :  { %58 = dma.hbm_to_vmem [thread:$0]  %s1626_s2, 2048, %s53_s25, [#allocation6], %s1228_s17, %s1228_s17, %s1229_s18  }
  0x22   :  { %1220 = dma.done.wait [#allocation3], 256  }
  0x23   :  { %1221 = vsyncadd [#allocation3], 4294967040 }
  0x24   :  { %1222 = dma.done.wait [#allocation6], 2304  }
  0x25   :  { %1223 = vsyncadd [#allocation6], 4294964992  ;;  %v100_v0 = vld [vmem:[#allocation7 + $0x78] sm:$0xff]  ;;  %v99_v1 = vld [vmem:[#allocation7 + $0x70] sm:$0xff]  ;;  %s1231_s0 = smov [#allocation8]  }
  0x26   :  { %v98_v2 = vld [vmem:[#allocation7 + $0x68] sm:$0xff]  ;;  %v1261_v3 = vand.u32 4294901760, %v100_v0  ;;  %v1263_v4 = vand.u32 4294901760, %v99_v1  ;;  %v97_v6 = vld [vmem:[#allocation7 + $0x60] sm:$0xff]  ;;  %v96_v7 = vld [vmem:[#allocation7 + $0x58] sm:$0xff]  ;;  %s801_s2 = sshll.u32 %s1231_s0, 4  ;;  %s802_s2 = int_to_ptr.vmem [resolvable:$true] %s801_s2 }
  0x27   :  { %v1265_v5 = vand.u32 4294901760, %v98_v2  ;;  %v95_v8 = vld [vmem:[#allocation7 + $0x50] sm:$0xff]  ;;  %v1267_v9 = vand.u32 4294901760, %v97_v6  ;;  %v1269_v10 = vand.u32 4294901760, %v96_v7  ;;  %v94_v12 = vld [vmem:[#allocation7 + $0x48] sm:$0xff]  ;;  %v93_v13 = vld [vmem:[#allocation7 + $0x40] sm:$0xff]  ;;  %p1205_p2 = scmp.lt.s32.totalorder %s802_s2, %s802_s2 }
  0x28   :  { %v1271_v11 = vand.u32 4294901760, %v95_v8  ;;  %923 = vmatprep.subr.mxu0 %v1261_v3  ;;  %v1275_v14 = vsub.f32 %v100_v0, %v1261_v3  ;;  %v1278_v15 = vsub.f32 %v99_v1, %v1263_v4  ;;  %v1280_v16 = vand.u32 4294901760, %v94_v12  ;;  %v92_v18 = vld [vmem:[#allocation7 + $0x38] sm:$0xff]  ;;  %v91_v25 = vld [vmem:[#allocation7 + $0x30] sm:$0xff]  ;;  %v90_v35 = vld [vmem:[#allocation7 + $0x28] sm:$0xff]  ;;  %s1200_s28 = scalar_lea.vmem %s802_s2, 128 }
  0x29   :  { %v1283_v17 = vsub.f32 %v98_v2, %v1265_v5  ;;  %924 = vmatpush3.msra.mxu0 %v1261_v3  ;;  %v1287_v19 = vsub.f32 %v97_v6, %v1267_v9  ;;  %v1290_v20 = vsub.f32 %v96_v7, %v1269_v10  ;;  %v1302_v24 = vand.u32 4294901760, %v93_v13  ;;  %v89_v40 = vld [vmem:[#allocation7 + $0x20] sm:$0xff]  ;;  %v88_v48 = vld [vmem:[#allocation7 + $0x18] sm:$0xff]  ;;  %v1353_v49 = vld [vmem:[#allocation5] sm:$0xff]  ;;  %p1201_p1 = scmp.ne.s32.totalorder %s802_s2, %s1200_s28  ;;  %p1206_p3 = scmp.lt.s32.totalorder %s1200_s28, %s1200_s28 }
  0x2a   :  { %925 = vmatprep.subr.mxu0 %v1263_v4  ;;  %v1294_v21 = vand.u32 4294901760, %v1275_v14  ;;  %v1297_v22 = vand.u32 4294901760, %v1278_v15  ;;  %v1308_v27 = vand.u32 4294901760, %v92_v18  ;;  %v1314_v29 = vsub.f32 %v95_v8, %v1271_v11  ;;  %1632 = vst [vmem:[#allocation12_spill] sm:$0xff] %v1353_v49  ;;  %v1364_v54 = vld [vmem:[#allocation5 + $0x8] sm:$0xff]  ;;  %v87_v59 = vld [vmem:[#allocation7 + $0x10] sm:$0xff] }
  0x2b   :  { %v1300_v23 = vand.u32 4294901760, %v1283_v17  ;;  %926 = vmatpush3.msra.mxu0 %v1263_v4  ;;  %v1306_v26 = vand.u32 4294901760, %v1287_v19  ;;  %v1311_v28 = vand.u32 4294901760, %v1290_v20  ;;  %v1324_v33 = vsub.f32 %v94_v12, %v1280_v16  ;;  %1633 = vst [vmem:[#allocation13_spill] sm:$0xff] %v1364_v54  ;;  %v86_v2 = vld [vmem:[#allocation7 + $0x8] sm:$0xff]  ;;  %p1207_p4 = por %p1206_p3, %p1205_p2 }
  0x2c   :  { %927 = vmatprep.subr.mxu0 %v1265_v5  ;;  %v206_v30 = vsub.f32 %v1275_v14, %v1294_v21  ;;  %v213_v31 = vsub.f32 %v1278_v15, %v1297_v22  ;;  %v1327_v34 = vand.u32 4294901760, %v91_v25  ;;  %v1333_v39 = vand.u32 4294901760, %v1314_v29 }
  0x2d   :  { %v220_v32 = vsub.f32 %v1283_v17, %v1300_v23  ;;  %928 = vmatpush3.msra.mxu0 %v1265_v5  ;;  %v227_v38 = vsub.f32 %v1287_v19, %v1306_v26  ;;  %v234_v41 = vsub.f32 %v1290_v20, %v1311_v28  ;;  %v1339_v42 = vand.u32 4294901760, %v1324_v33  ;;  %p1208_p5 = pnand %p1207_p4, %p1201_p1 }
  0x2e   :  { %929 = vmatprep.subr.mxu0 %v1267_v9  ;;  %v207_v36 = vand.u32 4294901760, %v206_v30  ;;  %v214_v37 = vand.u32 4294901760, %v213_v31  ;;  %v1342_v43 = vsub.f32 %v93_v13, %v1302_v24  ;;  %v1345_v45 = vand.u32 4294901760, %v90_v35 }
  0x2f   :  { %930 = vmatpush3.msra.mxu0 %v1267_v9  ;;  %v221_v44 = vand.u32 4294901760, %v220_v32  ;;  %v1348_v46 = vsub.f32 %v92_v18, %v1308_v27  ;;  %v1351_v47 = vand.u32 4294901760, %v89_v40  ;;  %v228_v50 = vand.u32 4294901760, %v227_v38  ;;  %v85_v18 = vld [vmem:[#allocation7] sm:$0xff] }
  0x30   :  { %931 = vmatprep.subr.mxu0 %v1269_v10  ;;  %958 = vmatprep.subr.mxu1 %v207_v36  ;;  %v241_v51 = vsub.f32 %v1314_v29, %v1333_v39  ;;  %v1359_v52 = vand.u32 4294901760, %v1342_v43  ;;  %v1362_v53 = vsub.f32 %v91_v25, %v1327_v34  ;;  %v235_v55 = vand.u32 4294901760, %v234_v41 }
  0x31   :  { %932 = vmatpush3.msra.mxu0 %v1269_v10  ;;  %959 = vmatpush3.msra.mxu1 %v207_v36  ;;  %v248_v56 = vsub.f32 %v1324_v33, %v1339_v42  ;;  %v1370_v57 = vand.u32 4294901760, %v88_v48  ;;  %v1373_v58 = vand.u32 4294901760, %v1348_v46  ;;  %v1376_v60 = vsub.f32 %v90_v35, %v1345_v45 }
  0x32   :  { %933 = vmatprep.subr.mxu0 %v1271_v11  ;;  %960 = vmatprep.subr.mxu1 %v214_v37  ;;  %v1379_v61 = vand.u32 4294901760, %v1353_v49  ;;  %v1383_v62 = vand.u32 4294901760, %v1364_v54  ;;  %v242_v63 = vand.u32 4294901760, %v241_v51  ;;  %v255_v0 = vsub.f32 %v1342_v43, %v1359_v52 }
  0x33   :  { %934 = vmatpush3.msra.mxu0 %v1271_v11  ;;  %961 = vmatpush3.msra.mxu1 %v214_v37  ;;  %v1389_v1 = vand.u32 4294901760, %v1362_v53  ;;  %v1392_v6 = vsub.f32 %v89_v40, %v1351_v47  ;;  %v249_v7 = vand.u32 4294901760, %v248_v56  ;;  %v1395_v8 = vand.u32 4294901760, %v87_v59 }
  0x34   :  { %935 = vmatprep.subr.mxu0 %v1280_v16  ;;  %962 = vmatprep.subr.mxu1 %v221_v44  ;;  %v262_v12 = vsub.f32 %v1348_v46, %v1373_v58  ;;  %v1401_v13 = vand.u32 4294901760, %v1376_v60  ;;  %v1405_v25 = vsub.f32 %v1353_v49, %v1379_v61  ;;  %v1408_v30 = vsub.f32 %v88_v48, %v1370_v57 }
  0x35   :  { %936 = vmatpush3.msra.mxu0 %v1280_v16  ;;  %963 = vmatpush3.msra.mxu1 %v221_v44  ;;  %v1411_v31 = vand.u32 4294901760, %v86_v2  ;;  %v1415_v32 = vsub.f32 %v1364_v54, %v1383_v62  ;;  %v256_v35 = vand.u32 4294901760, %v255_v0  ;;  %v269_v36 = vsub.f32 %v1362_v53, %v1389_v1 }
  0x36   :  { %937 = vmatprep.subr.mxu0 %v1302_v24  ;;  %964 = vmatprep.subr.mxu1 %v228_v50  ;;  %v1421_v37 = vand.u32 4294901760, %v1392_v6  ;;  %v1424_v38 = vand.u32 4294901760, %v85_v18  ;;  %v1427_v40 = vsub.f32 %v87_v59, %v1395_v8  ;;  %v263_v41 = vand.u32 4294901760, %v262_v12 }
  0x37   :  { %938 = vmatpush3.msra.mxu0 %v1302_v24  ;;  %965 = vmatpush3.msra.mxu1 %v228_v50  ;;  %v276_v44 = vsub.f32 %v1376_v60, %v1401_v13  ;;  %v1628_v48 = vand.u32 4294901760, %v1405_v25  ;;  %v1434_v50 = vand.u32 4294901760, %v1408_v30  ;;  %v1629_v51 = vand.u32 4294901760, %v1415_v32 }
  0x38   :  { %939 = vmatprep.subr.mxu0 %v1308_v27  ;;  %966 = vmatprep.subr.mxu1 %v235_v55  ;;  %v270_v56 = vand.u32 4294901760, %v269_v36  ;;  %v283_v59 = vsub.f32 %v1392_v6, %v1421_v37  ;;  %v1449_v0 = vsub.f32 %v85_v18, %v1424_v38 }
  0x39   :  { %940 = vmatpush3.msra.mxu0 %v1308_v27  ;;  %967 = vmatpush3.msra.mxu1 %v235_v55  ;;  %v1439_v55 = vsub.f32 %v86_v2, %v1411_v31  ;;  %v277_v2 = vand.u32 4294901760, %v276_v44  ;;  %v290_v12 = vsub.f32 %v1408_v30, %v1434_v50 }
  0x3a   :  { %941 = vmatprep.subr.mxu0 %v1327_v34  ;;  %968 = vmatprep.subr.mxu1 %v242_v63  ;;  %v284_v36 = vand.u32 4294901760, %v283_v59 }
  0x3b   :  { %942 = vmatpush3.msra.mxu0 %v1327_v34  ;;  %969 = vmatpush3.msra.mxu1 %v242_v63  ;;  %v1446_v63 = vand.u32 4294901760, %v1427_v40  ;;  %v1462_v18 = vand.u32 4294901760, %v1439_v55 }
  0x3c   :  { %943 = vmatprep.subr.mxu0 %v1345_v45  ;;  %970 = vmatprep.subr.mxu1 %v249_v7 }
  0x3d   :  { %944 = vmatpush3.msra.mxu0 %v1345_v45  ;;  %971 = vmatpush3.msra.mxu1 %v249_v7  ;;  %v185_v7 = vsub.f32 %v1405_v25, %v1628_v48  ;;  %v297_v44 = vsub.f32 %v1427_v40, %v1446_v63  ;;  %v1469_v48 = vand.u32 4294901760, %v1449_v0  ;;  %v304_v59 = vsub.f32 %v1439_v55, %v1462_v18 }
  0x3e   :  { %945 = vmatprep.subr.mxu0 %v1351_v47  ;;  %972 = vmatprep.subr.mxu1 %v256_v35 }
  0x3f   :  { %946 = vmatpush3.msra.mxu0 %v1351_v47  ;;  %973 = vmatpush3.msra.mxu1 %v256_v35  ;;  %v195_v35 = vsub.f32 %v1415_v32, %v1629_v51  ;;  %v291_v51 = vand.u32 4294901760, %v290_v12  ;;  %v311_v54 = vsub.f32 %v1449_v0, %v1469_v48 }
  0x40   :  { %947 = vmatprep.subr.mxu0 %v1370_v57  ;;  %974 = vmatprep.subr.mxu1 %v263_v41 }
  0x41   :  { %948 = vmatpush3.msra.mxu0 %v1370_v57  ;;  %975 = vmatpush3.msra.mxu1 %v263_v41  ;;  %v186_v41 = vand.u32 4294901760, %v185_v7  ;;  %v196_v49 = vand.u32 4294901760, %v195_v35  ;;  %v312_v7 = vand.u32 4294901760, %v311_v54 }
  0x42   :  { %949 = vmatprep.subr.mxu0 %v1395_v8  ;;  %976 = vmatprep.subr.mxu1 %v270_v56 }
  0x43   :  { %950 = vmatpush3.msra.mxu0 %v1395_v8  ;;  %977 = vmatpush3.msra.mxu1 %v270_v56  ;;  %v298_v56 = vand.u32 4294901760, %v297_v44 }
  0x44   :  { %951 = vmatprep.subr.mxu0 %v1411_v31  ;;  %978 = vmatprep.subr.mxu1 %v277_v2 }
  0x45   :  { %952 = vmatpush3.msra.mxu0 %v1411_v31  ;;  %979 = vmatpush3.msra.mxu1 %v277_v2  ;;  %v305_v2 = vand.u32 4294901760, %v304_v59 }
  0x46   :  { %953 = vmatprep.subr.mxu0 %v1424_v38  ;;  %980 = vmatprep.subr.mxu1 %v284_v36 }
  0x47   :  { %954 = vmatpush3.msra.mxu0 %v1424_v38  ;;  %981 = vmatpush3.msra.mxu1 %v284_v36 }
  0x48   :  { %955 = vmatprep.mubr.f32.mxu0 %v186_v41  ;;  %982 = vmatprep.subr.mxu1 %v291_v51 }
  0x49   :  { %993 = vmatprep.subr.mxu0 %v1275_v14  ;;  %956 = vmatmul.mubr.f32.vlgmr.msra.gmra.mxu0 %v196_v49 }
  0x4a   :  { %983 = vmatpush3.msra.mxu1 %v291_v51  ;;  %994 = vmatpush3.msra.mxu0 %v1275_v14  ;;  %v1634_v14 = vand.u32 4294901760, %v1405_v25 }
  0x4b   :  { %984 = vmatprep.subr.mxu1 %v298_v56  ;;  %995 = vmatprep.subr.mxu0 %v1278_v15 }
  0x4c   :  { %985 = vmatpush3.msra.mxu1 %v298_v56  ;;  %996 = vmatpush3.msra.mxu0 %v1278_v15  ;;  %v1635_v15 = vand.u32 4294901760, %v1415_v32 }
  0x4d   :  { %986 = vmatprep.subr.mxu1 %v305_v2  ;;  %997 = vmatprep.subr.mxu0 %v1283_v17 }
  0x4e   :  { %987 = vmatpush3.msra.mxu1 %v305_v2  ;;  %998 = vmatpush3.msra.mxu0 %v1283_v17 }
  0x4f   :  { %988 = vmatprep.subr.mxu1 %v312_v7  ;;  %999 = vmatprep.subr.mxu0 %v1287_v19 }
  0x50   :  { %989 = vmatpush3.msra.mxu1 %v312_v7  ;;  %990 = vmatprep.mubr.f32.mxu1 %v1379_v61 }
  0x51   :  { %1000 = vmatpush3.msra.mxu0 %v1287_v19  ;;  %991 = vmatmul.mubr.f32.vlgmr.msra.gmra.mxu1 %v1383_v62 }
  0x52   :  { %1001 = vmatprep.subr.mxu0 %v1290_v20  ;;  %1028 = vmatprep.subr.mxu1 %v1261_v3 }
  0x53   :  { %1002 = vmatpush3.msra.mxu0 %v1290_v20  ;;  %1029 = vmatpush3.msra.mxu1 %v1261_v3 }
  0x54   :  { %1003 = vmatprep.subr.mxu0 %v1314_v29  ;;  %1030 = vmatprep.subr.mxu1 %v1263_v4 }
  0x55   :  { %1004 = vmatpush3.msra.mxu0 %v1314_v29  ;;  %1031 = vmatpush3.msra.mxu1 %v1263_v4 }
  0x56   :  { %1005 = vmatprep.subr.mxu0 %v1324_v33  ;;  %1032 = vmatprep.subr.mxu1 %v1265_v5 }
  0x57   :  { %1006 = vmatpush3.msra.mxu0 %v1324_v33  ;;  %1033 = vmatpush3.msra.mxu1 %v1265_v5 }
  0x58   :  { %1007 = vmatprep.subr.mxu0 %v1342_v43  ;;  %1034 = vmatprep.subr.mxu1 %v1267_v9 }
  0x59   :  { %1008 = vmatpush3.msra.mxu0 %v1342_v43  ;;  %1035 = vmatpush3.msra.mxu1 %v1267_v9 }
  0x5a   :  { %1009 = vmatprep.subr.mxu0 %v1348_v46  ;;  %1036 = vmatprep.subr.mxu1 %v1269_v10 }
  0x5b   :  { %1010 = vmatpush3.msra.mxu0 %v1348_v46  ;;  %1037 = vmatpush3.msra.mxu1 %v1269_v10  ;;  %v1637_v46 = vld [vmem:[#allocation12_spill] sm:$0xff] }
  0x5c   :  { %1011 = vmatprep.subr.mxu0 %v1362_v53  ;;  %1038 = vmatprep.subr.mxu1 %v1271_v11 }
  0x5d   :  { %1012 = vmatpush3.msra.mxu0 %v1362_v53  ;;  %1039 = vmatpush3.msra.mxu1 %v1271_v11 }
  0x5e   :  { %1013 = vmatprep.subr.mxu0 %v1376_v60  ;;  %1040 = vmatprep.subr.mxu1 %v1280_v16 }
  0x5f   :  { %1014 = vmatpush3.msra.mxu0 %v1376_v60  ;;  %1041 = vmatpush3.msra.mxu1 %v1280_v16 }
  0x60   :  { %1015 = vmatprep.subr.mxu0 %v1392_v6  ;;  %1042 = vmatprep.subr.mxu1 %v1302_v24 }
  0x61   :  { %1016 = vmatpush3.msra.mxu0 %v1392_v6  ;;  %1043 = vmatpush3.msra.mxu1 %v1302_v24 }
  0x62   :  { %1017 = vmatprep.subr.mxu0 %v1408_v30  ;;  %1044 = vmatprep.subr.mxu1 %v1308_v27 }
  0x63   :  { %1018 = vmatpush3.msra.mxu0 %v1408_v30  ;;  %1045 = vmatpush3.msra.mxu1 %v1308_v27 }
  0x64   :  { %1019 = vmatprep.subr.mxu0 %v1427_v40  ;;  %1046 = vmatprep.subr.mxu1 %v1327_v34 }
  0x65   :  { %1020 = vmatpush3.msra.mxu0 %v1427_v40  ;;  %1047 = vmatpush3.msra.mxu1 %v1327_v34 }
  0x66   :  { %1021 = vmatprep.subr.mxu0 %v1439_v55  ;;  %1048 = vmatprep.subr.mxu1 %v1345_v45 }
  0x67   :  { %1022 = vmatpush3.msra.mxu0 %v1439_v55  ;;  %1049 = vmatpush3.msra.mxu1 %v1345_v45 }
  0x68   :  { %1023 = vmatprep.subr.mxu0 %v1449_v0  ;;  %1050 = vmatprep.subr.mxu1 %v1351_v47 }
  0x69   :  { %1024 = vmatpush3.msra.mxu0 %v1449_v0  ;;  %1025 = vmatprep.mubr.f32.mxu0 %v1405_v25 }
  0x6a   :  { %1051 = vmatpush3.msra.mxu1 %v1351_v47  ;;  %1026 = vmatmul.mubr.f32.vlgmr.msra.gmra.mxu0 %v1415_v32 }
  0x6b   :  { %1052 = vmatprep.subr.mxu1 %v1370_v57  ;;  %1063 = vmatprep.subr.mxu0 %v1294_v21 }
  0x6c   :  { %1053 = vmatpush3.msra.mxu1 %v1370_v57  ;;  %1064 = vmatpush3.msra.mxu0 %v1294_v21 }
  0x6d   :  { %1054 = vmatprep.subr.mxu1 %v1395_v8  ;;  %1065 = vmatprep.subr.mxu0 %v1297_v22 }
  0x6e   :  { %1055 = vmatpush3.msra.mxu1 %v1395_v8  ;;  %1066 = vmatpush3.msra.mxu0 %v1297_v22 }
  0x6f   :  { %1056 = vmatprep.subr.mxu1 %v1411_v31  ;;  %1067 = vmatprep.subr.mxu0 %v1300_v23 }
  0x70   :  { %1057 = vmatpush3.msra.mxu1 %v1411_v31  ;;  %1068 = vmatpush3.msra.mxu0 %v1300_v23  ;;  %v84_v23 = vld [vmem:[#allocation2 + $0x8] sm:$0xff] }
  0x71   :  { %1058 = vmatprep.subr.mxu1 %v1424_v38  ;;  %1069 = vmatprep.subr.mxu0 %v1306_v26 }
  0x72   :  { %1059 = vmatpush3.msra.mxu1 %v1424_v38  ;;  %1060 = vmatprep.mubr.f32.mxu1 %v1634_v14 }
  0x73   :  { %1070 = vmatpush3.msra.mxu0 %v1306_v26  ;;  %1061 = vmatmul.mubr.f32.vlgmr.msra.gmra.mxu1 %v1635_v15 }
  0x74   :  { %1071 = vmatprep.subr.mxu0 %v1311_v28  ;;  %1098 = vmatprep.subr.mxu1 %v1261_v3 }
  0x75   :  { %1072 = vmatpush3.msra.mxu0 %v1311_v28  ;;  %1099 = vmatpush3.msra.mxu1 %v1261_v3  ;;  %v83_v28 = vld [vmem:[#allocation2] sm:$0xff] }
  0x76   :  { %1073 = vmatprep.subr.mxu0 %v1333_v39  ;;  %1100 = vmatprep.subr.mxu1 %v1263_v4 }
  0x77   :  { %1074 = vmatpush3.msra.mxu0 %v1333_v39  ;;  %1101 = vmatpush3.msra.mxu1 %v1263_v4 }
  0x78   :  { %1075 = vmatprep.subr.mxu0 %v1339_v42  ;;  %1102 = vmatprep.subr.mxu1 %v1265_v5 }
  0x79   :  { %1076 = vmatpush3.msra.mxu0 %v1339_v42  ;;  %1103 = vmatpush3.msra.mxu1 %v1265_v5 }
  0x7a   :  { %1077 = vmatprep.subr.mxu0 %v1359_v52  ;;  %1104 = vmatprep.subr.mxu1 %v1267_v9 }
  0x7b   :  { %1078 = vmatpush3.msra.mxu0 %v1359_v52  ;;  %1105 = vmatpush3.msra.mxu1 %v1267_v9 }
  0x7c   :  { %1079 = vmatprep.subr.mxu0 %v1373_v58  ;;  %1106 = vmatprep.subr.mxu1 %v1269_v10 }
  0x7d   :  { %1080 = vmatpush3.msra.mxu0 %v1373_v58  ;;  %1107 = vmatpush3.msra.mxu1 %v1269_v10 }
  0x7e   :  { %1081 = vmatprep.subr.mxu0 %v1389_v1  ;;  %1108 = vmatprep.subr.mxu1 %v1271_v11 }
  0x7f   :  { %1082 = vmatpush3.msra.mxu0 %v1389_v1  ;;  %1109 = vmatpush3.msra.mxu1 %v1271_v11 }
  0x80   :  { %1083 = vmatprep.subr.mxu0 %v1401_v13  ;;  %1110 = vmatprep.subr.mxu1 %v1280_v16 }
  0x81   :  { %1084 = vmatpush3.msra.mxu0 %v1401_v13  ;;  %1111 = vmatpush3.msra.mxu1 %v1280_v16 }
  0x82   :  { %1085 = vmatprep.subr.mxu0 %v1421_v37  ;;  %1112 = vmatprep.subr.mxu1 %v1302_v24 }
  0x83   :  { %1086 = vmatpush3.msra.mxu0 %v1421_v37  ;;  %1113 = vmatpush3.msra.mxu1 %v1302_v24 }
  0x84   :  { %1087 = vmatprep.subr.mxu0 %v1434_v50  ;;  %1114 = vmatprep.subr.mxu1 %v1308_v27 }
  0x85   :  { %1088 = vmatpush3.msra.mxu0 %v1434_v50  ;;  %1115 = vmatpush3.msra.mxu1 %v1308_v27 }
  0x86   :  { %1089 = vmatprep.subr.mxu0 %v1446_v63  ;;  %1116 = vmatprep.subr.mxu1 %v1327_v34 }
  0x87   :  { %1090 = vmatpush3.msra.mxu0 %v1446_v63  ;;  %1117 = vmatpush3.msra.mxu1 %v1327_v34  ;;  %v1636_v34 = vld [vmem:[#allocation13_spill] sm:$0xff] }
  0x88   :  { %1091 = vmatprep.subr.mxu0 %v1462_v18  ;;  %1118 = vmatprep.subr.mxu1 %v1345_v45  ;;  %v786_v39 = vsub.f32 %v84_v23, %v1636_v34 }
  0x89   :  { %1092 = vmatpush3.msra.mxu0 %v1462_v18  ;;  %1119 = vmatpush3.msra.mxu1 %v1345_v45 }
  0x8a   :  { %1093 = vmatprep.subr.mxu0 %v1469_v48  ;;  %1120 = vmatprep.subr.mxu1 %v1351_v47 }
  0x8b   :  { %1094 = vmatpush3.msra.mxu0 %v1469_v48  ;;  %1095 = vmatprep.mubr.f32.mxu0 %v1379_v61 }
  0x8c   :  { %1121 = vmatpush3.msra.mxu1 %v1351_v47  ;;  %1096 = vmatmul.mubr.f32.vlgmr.msra.gmra.mxu0 %v1383_v62  ;;  %v785_v47 = vsub.f32 %v83_v28, %v1637_v46 }
  0x8d   :  { %1122 = vmatprep.subr.mxu1 %v1370_v57  ;;  %1130 = vmatprep.mubr.f32.mxu1 %v1379_v61 }
  0x8e   :  { %1123 = vmatpush3.msra.mxu1 %v1370_v57 }
  0x8f   :  { %1124 = vmatprep.subr.mxu1 %v1395_v8 }
  0x90   :  { %1125 = vmatpush3.msra.mxu1 %v1395_v8 }
  0x91   :  { %1126 = vmatprep.subr.mxu1 %v1411_v31 }
  0x92   :  { %1127 = vmatpush3.msra.mxu1 %v1411_v31 }
  0x93   :  { %1128 = vmatprep.subr.mxu1 %v1424_v38 }
  0x94   :  { %1129 = vmatpush3.msra.mxu1 %v1424_v38 }
  0x95   :  { %1131 = vmatmul.mubr.f32.vlgmr.msra.gmra.mxu1 %v1383_v62 }
 0x109   :  { %v957_v3 = vpop.f32.mrf.mxu0 }
 0x10b   :  { %v188_v4 = vpop.f32.mrf.mxu0 }
 0x111   :  { %v992_v5 = vpop.f32.mrf.mxu1 }
 0x112   :  { %v356_v17 = vadd.f32 %v992_v5, %v957_v3 }
 0x113   :  { %v349_v10 = vpop.f32.mrf.mxu1 }
 0x114   :  { %v350_v20 = vadd.f32 %v349_v10, %v188_v4 }
 0x12a   :  { %v1027_v9 = vpop.f32.mrf.mxu0 }
 0x12b   :  { %v467_v21 = vadd.f32 %v1027_v9, %v356_v17 }
 0x12c   :  { %v459_v11 = vpop.f32.mrf.mxu0 }
 0x12d   :  { %v460_v24 = vadd.f32 %v459_v11, %v350_v20 }
 0x133   :  { %v1062_v16 = vpop.f32.mrf.mxu1 }
 0x134   :  { %v564_v26 = vadd.f32 %v1062_v16, %v467_v21 }
 0x135   :  { %v555_v22 = vpop.f32.mrf.mxu1 }
 0x136   :  { %v556_v29 = vadd.f32 %v555_v22, %v460_v24 }
 0x14c   :  { %v1097_v19 = vpop.f32.mrf.mxu0 }
 0x14d   :  { %v689_v33 = vadd.f32 %v1097_v19, %v564_v26 }
 0x14e   :  { %v682_v27 = vpop.f32.mrf.mxu0 }
 0x14f   :  { %v683_v43 = vadd.f32 %v682_v27, %v556_v29 }
 0x155   :  { %v1132_v42 = vpop.f32.mrf.mxu1 }
 0x156   :  { %v782_v45 = vadd.f32 %v1132_v42, %v689_v33 }
 0x157   :  { %v775_v49 = vpop.f32.mrf.mxu1 }
 0x158   :  { %v788_v52 = vadd.f32 %v786_v39, %v782_v45  ;;  %v776_v53 = vadd.f32 %v775_v49, %v683_v43 }
 0x15a   :  { %v787_v54 = vadd.f32 %v785_v47, %v776_v53  ;;  %v790_v57 = vmul.f32 %v788_v52, %v788_v52 }
 0x15c   :  { %v789_v58 = vmul.f32 %v787_v54, %v787_v54 }
 0x15e   :  { %v792_v60 = vadd.f32 %v790_v57, %v789_v58 }
 0x160   :  { %794 = vst [vmem:[#allocation8] sm:$0xff] %v792_v60 }
 0x161   :  { %1211 = shalt.err (!%p1208_p5)
}
 0x162   :  { %804 = dma.vmem_to_hbm [thread:$0]  %s802_s2, 128, %s1627_s3, [#allocation4]  }
 0x163   :  { %1224 = dma.done.wait [#allocation4], 128  }
 0x164   :  { %1225 = vsyncadd [#allocation4], 4294967168 }
 0x165   :  { %808 = vsyncpa [#allocation3], 1 }
 0x166   :  { %809 = vsyncpa [#allocation6], 1 }
 0x167   :  { %810 = vsyncpa [#allocation4], 1 }

</bundles_post_ra>
